<compile_context>
chip_gen: v5e
topology: v5e:2x2
jax: 0.10.0
libtpu: 0.0.40
codegen_flags: <defaults>
</compile_context>

<pallas_src>
import functools

import jax
import jax.numpy as jnp
from jax.experimental import pallas as pl
from jax.experimental.pallas import tpu as pltpu


def _mlp_kernel(x_ref, w1_ref, b1_ref, w2_ref, b2_ref, w3_ref, b3_ref, o_ref):
    # Layer 1: Linear + ReLU (hidden_act). bf16 operands -> MXU, f32 accumulate.
    x = x_ref[...].astype(jnp.bfloat16)
    h = jnp.dot(x, w1_ref[...], preferred_element_type=jnp.float32)
    h = jnp.maximum(h + b1_ref[...], 0.0)
    # Layer 2: Linear + ReLU (hidden_act).
    h = jnp.dot(h.astype(jnp.bfloat16), w2_ref[...],
                preferred_element_type=jnp.float32)
    h = jnp.maximum(h + b2_ref[...], 0.0)
    # Layer 3: Linear + Identity (out_act). Direct (bt, out_dim) store.
    y = jnp.dot(h.astype(jnp.bfloat16), w3_ref[...],
                preferred_element_type=jnp.float32)
    o_ref[...] = (y + b3_ref[...]).astype(o_ref.dtype)


def _round_up(n, m):
    return ((n + m - 1) // m) * m


def _cdiv(a, b):
    return -(-a // b)


def _batch_tiling(B, b_tile):
    """Pick a sublane-aligned batch tile; guarantee >=2 (preferably even) grid steps
    when B is big enough so v7x's second TensorCore is not idle."""
    if B <= 16:
        bt = max(8, _round_up(B, 8))
        return bt, 1
    steps = max(2, _cdiv(B, b_tile))
    if steps % 2:
        steps += 1  # even step count -> balanced across 2 TCs on v7x
    bt = min(b_tile, _round_up(_cdiv(B, steps), 8))
    steps = _cdiv(B, bt)  # actual step count after rounding the tile
    return bt, steps


def prepare_params(w1, b1, w2, b2, w3, b3):
    """One-time weight transform (hoisted out of the per-call path):
    weights -> bf16 for the MXU, biases stay f32 shaped [1, out]."""
    bf = jnp.bfloat16
    return (w1.astype(bf), b1.astype(jnp.float32),
            w2.astype(bf), b2.astype(jnp.float32),
            w3.astype(bf), b3.astype(jnp.float32))


@functools.partial(jax.jit, static_argnames=("b_tile",))
def mlp_forward(x, w1, b1, w2, b2, w3, b3, *, b_tile=1024):
    """Fused 3-layer MLP. Batch-tiled grid; weights held resident in VMEM."""
    B, in_dim = x.shape
    h1 = w1.shape[1]
    h2 = w2.shape[1]
    out_dim = w3.shape[1]

    bt, steps = _batch_tiling(B, b_tile)
    grid = (steps,)

    # Weights/biases: constant index_map -> same block every step, DMA'd once and
    # kept resident in VMEM across batch tiles.
    def const(arr):
        n = arr.ndim
        return pl.BlockSpec(arr.shape, lambda i, n=n: (0,) * n)

    flops = 2 * B * (in_dim * h1 + h1 * h2 + h2 * out_dim)
    bytes_accessed = (B * (in_dim + out_dim) * 4
                      + (in_dim * h1 + h1 * h2 + h2 * out_dim) * 2
                      + (h1 + h2 + out_dim) * 4)

    out = pl.pallas_call(
        _mlp_kernel,
        out_shape=jax.ShapeDtypeStruct((B, out_dim), x.dtype),
        grid=grid,
        in_specs=[
            pl.BlockSpec((bt, in_dim), lambda i: (i, 0)),
            const(w1), const(b1),
            const(w2), const(b2),
            const(w3), const(b3),
        ],
        out_specs=pl.BlockSpec((bt, out_dim), lambda i: (i, 0)),
        compiler_params=pltpu.CompilerParams(
            dimension_semantics=("parallel",),
        ),
        cost_estimate=pl.CostEstimate(
            flops=flops, transcendentals=0, bytes_accessed=bytes_accessed),
    )(x, w1, b1, w2, b2, w3, b3)

    return out


def init_linear(key, in_dim, out_dim, dtype=jnp.float32):
    """Deterministic init mimicking torch.nn.Linear (uniform +-1/sqrt(in_dim)).
    Weight is stored as [in_dim, out_dim] (transposed vs PyTorch)."""
    kw, kb = jax.random.split(key)
    bound = 1.0 / jnp.sqrt(jnp.asarray(in_dim, dtype))
    w = jax.random.uniform(kw, (in_dim, out_dim), dtype, -bound, bound)
    b = jax.random.uniform(kb, (1, out_dim), dtype, -bound, bound)
    return w, b


def reference_mlp(x, w1, b1, w2, b2, w3, b3):
    h = jnp.maximum(x @ w1 + b1, 0.0)
    h = jnp.maximum(h @ w2 + b2, 0.0)
    return h @ w3 + b3


if __name__ == "__main__":
    # MLP(input_dim=16, output_dim=4, num_neurons=[64, 64])
    input_dim, output_dim = 16, 4
    num_neurons = [64, 64]

    key = jax.random.PRNGKey(0)
    kx, k1, k2, k3, kx2 = jax.random.split(key, 5)

    w1, b1 = init_linear(k1, input_dim, num_neurons[0])
    w2, b2 = init_linear(k2, num_neurons[0], num_neurons[1])
    w3, b3 = init_linear(k3, num_neurons[1], output_dim)

    # One-time prep (bf16 weight cast) hoisted out of the forward path.
    p = prepare_params(w1, b1, w2, b2, w3, b3)

    # bf16 MXU operands relax exact f32 agreement -> looser tolerance vs f32 ref.
    TOL = 5e-2

    # Case 1: tiny batch (single grid step path).
    batch = 8
    x = jax.random.normal(kx, (batch, input_dim), jnp.float32)
    out = jax.block_until_ready(mlp_forward(x, *p))
    ref = reference_mlp(x, w1, b1, w2, b2, w3, b3)
    assert out.shape == (batch, output_dim)
    assert jnp.allclose(out, ref, atol=TOL, rtol=TOL)

    # Case 2: larger, non-multiple batch (exercises >=2 grid steps + ragged last
    # block masking, no wrapper-side padding copy).
    batch2 = 300
    x2 = jax.random.normal(kx2, (batch2, input_dim), jnp.float32)
    out2 = jax.block_until_ready(mlp_forward(x2, *p, b_tile=1024))
    ref2 = reference_mlp(x2, w1, b1, w2, b2, w3, b3)
    assert out2.shape == (batch2, output_dim)
    assert jnp.allclose(out2, ref2, atol=TOL, rtol=TOL)

    print("KERNEL_OK")
</pallas_src>

<mosaic_0001>
module attributes {stable_mosaic.version = 11 : i64} {
  func.func @_mlp_kernel(%arg0: i32, %arg1: memref<8x16xf32, #tpu.memory_space<vmem>>, %arg2: memref<16x64xbf16, #tpu.memory_space<vmem>>, %arg3: memref<1x64xf32, #tpu.memory_space<vmem>>, %arg4: memref<64x64xbf16, #tpu.memory_space<vmem>>, %arg5: memref<1x64xf32, #tpu.memory_space<vmem>>, %arg6: memref<64x4xbf16, #tpu.memory_space<vmem>>, %arg7: memref<1x4xf32, #tpu.memory_space<vmem>>, %arg8: memref<8x4xf32, #tpu.memory_space<vmem>>) attributes {dimension_semantics = [#tpu.dimension_semantics<parallel>], iteration_bounds = array<i64: 1>, scalar_prefetch = 0 : i64, scratch_operands = 0 : i64, tpu.core_type = #tpu.core_type<tc>, window_params = [{transform_indices = @transform_0, window_bounds = array<i64: 8, 16>}, {pipeline_mode = #tpu.pipeline_mode<synchronous>, transform_indices = @transform_1, window_bounds = array<i64: 16, 64>}, {pipeline_mode = #tpu.pipeline_mode<synchronous>, transform_indices = @transform_2, window_bounds = array<i64: 1, 64>}, {pipeline_mode = #tpu.pipeline_mode<synchronous>, transform_indices = @transform_3, window_bounds = array<i64: 64, 64>}, {pipeline_mode = #tpu.pipeline_mode<synchronous>, transform_indices = @transform_4, window_bounds = array<i64: 1, 64>}, {pipeline_mode = #tpu.pipeline_mode<synchronous>, transform_indices = @transform_5, window_bounds = array<i64: 64, 4>}, {pipeline_mode = #tpu.pipeline_mode<synchronous>, transform_indices = @transform_6, window_bounds = array<i64: 1, 4>}, {transform_indices = @transform_7, window_bounds = array<i64: 8, 4>}]} {
    %c0 = arith.constant 0 : index
    %c0_0 = arith.constant 0 : index
    %0 = vector.load %arg1[%c0, %c0_0] : memref<8x16xf32, #tpu.memory_space<vmem>>, vector<8x16xf32>
    %1 = arith.truncf %0 : vector<8x16xf32> to vector<8x16xbf16>
    %c0_1 = arith.constant 0 : index
    %c0_2 = arith.constant 0 : index
    %2 = vector.load %arg2[%c0_1, %c0_2] : memref<16x64xbf16, #tpu.memory_space<vmem>>, vector<16x64xbf16>
    %cst = arith.constant dense<0.000000e+00> : vector<8x64xf32>
    %3 = tpu.matmul %1, %2, %cst {dimension_numbers = #tpu.dot_dimension_numbers<[1], [0], [0], [1], [0, 0, 1, 1], [], []>} : vector<8x16xbf16>, vector<16x64xbf16>, vector<8x64xf32> -> vector<8x64xf32>
    %c0_3 = arith.constant 0 : index
    %c0_4 = arith.constant 0 : index
    %4 = vector.load %arg3[%c0_3, %c0_4] : memref<1x64xf32, #tpu.memory_space<vmem>>, vector<1x64xf32>
    %5 = vector.broadcast %4 : vector<1x64xf32> to vector<8x64xf32>
    %6 = arith.addf %3, %5 : vector<8x64xf32>
    %cst_5 = arith.constant 0.000000e+00 : f32
    %7 = vector.broadcast %cst_5 : f32 to vector<8x64xf32>
    %8 = arith.maximumf %6, %7 : vector<8x64xf32>
    %9 = arith.truncf %8 : vector<8x64xf32> to vector<8x64xbf16>
    %c0_6 = arith.constant 0 : index
    %c0_7 = arith.constant 0 : index
    %10 = vector.load %arg4[%c0_6, %c0_7] : memref<64x64xbf16, #tpu.memory_space<vmem>>, vector<64x64xbf16>
    %cst_8 = arith.constant dense<0.000000e+00> : vector<8x64xf32>
    %11 = tpu.matmul %9, %10, %cst_8 {dimension_numbers = #tpu.dot_dimension_numbers<[1], [0], [0], [1], [0, 0, 1, 1], [], []>} : vector<8x64xbf16>, vector<64x64xbf16>, vector<8x64xf32> -> vector<8x64xf32>
    %c0_9 = arith.constant 0 : index
    %c0_10 = arith.constant 0 : index
    %12 = vector.load %arg5[%c0_9, %c0_10] : memref<1x64xf32, #tpu.memory_space<vmem>>, vector<1x64xf32>
    %13 = vector.broadcast %12 : vector<1x64xf32> to vector<8x64xf32>
    %14 = arith.addf %11, %13 : vector<8x64xf32>
    %cst_11 = arith.constant 0.000000e+00 : f32
    %15 = vector.broadcast %cst_11 : f32 to vector<8x64xf32>
    %16 = arith.maximumf %14, %15 : vector<8x64xf32>
    %17 = arith.truncf %16 : vector<8x64xf32> to vector<8x64xbf16>
    %c0_12 = arith.constant 0 : index
    %c0_13 = arith.constant 0 : index
    %18 = vector.load %arg6[%c0_12, %c0_13] : memref<64x4xbf16, #tpu.memory_space<vmem>>, vector<64x4xbf16>
    %cst_14 = arith.constant dense<0.000000e+00> : vector<8x4xf32>
    %19 = tpu.matmul %17, %18, %cst_14 {dimension_numbers = #tpu.dot_dimension_numbers<[1], [0], [0], [1], [0, 0, 1, 1], [], []>} : vector<8x64xbf16>, vector<64x4xbf16>, vector<8x4xf32> -> vector<8x4xf32>
    %c0_15 = arith.constant 0 : index
    %c0_16 = arith.constant 0 : index
    %20 = vector.load %arg7[%c0_15, %c0_16] : memref<1x4xf32, #tpu.memory_space<vmem>>, vector<1x4xf32>
    %21 = vector.broadcast %20 : vector<1x4xf32> to vector<8x4xf32>
    %22 = arith.addf %19, %21 : vector<8x4xf32>
    %c0_17 = arith.constant 0 : index
    %c0_18 = arith.constant 0 : index
    %23 = vector.load %arg8[%c0_17, %c0_18] : memref<8x4xf32, #tpu.memory_space<vmem>>, vector<8x4xf32>
    tpu.vector_store %arg8[%c0_17, %c0_18], %22 {strides = array<i32>} : memref<8x4xf32, #tpu.memory_space<vmem>>, vector<8x4xf32>,
    return
  }
  func.func @transform_0(%arg0: i32) -> (i32, i32) {
    %c0_i32 = arith.constant 0 : i32
    %c0_i32_0 = arith.constant 0 : i32
    return %arg0, %c0_i32 : i32, i32
  }
  func.func @transform_1(%arg0: i32) -> (i32, i32) {
    %c0_i32 = arith.constant 0 : i32
    %c0_i32_0 = arith.constant 0 : i32
    %c0_i32_1 = arith.constant 0 : i32
    return %c0_i32, %c0_i32_0 : i32, i32
  }
  func.func @transform_2(%arg0: i32) -> (i32, i32) {
    %c0_i32 = arith.constant 0 : i32
    %c0_i32_0 = arith.constant 0 : i32
    %c0_i32_1 = arith.constant 0 : i32
    return %c0_i32, %c0_i32_0 : i32, i32
  }
  func.func @transform_3(%arg0: i32) -> (i32, i32) {
    %c0_i32 = arith.constant 0 : i32
    %c0_i32_0 = arith.constant 0 : i32
    %c0_i32_1 = arith.constant 0 : i32
    return %c0_i32, %c0_i32_0 : i32, i32
  }
  func.func @transform_4(%arg0: i32) -> (i32, i32) {
    %c0_i32 = arith.constant 0 : i32
    %c0_i32_0 = arith.constant 0 : i32
    %c0_i32_1 = arith.constant 0 : i32
    return %c0_i32, %c0_i32_0 : i32, i32
  }
  func.func @transform_5(%arg0: i32) -> (i32, i32) {
    %c0_i32 = arith.constant 0 : i32
    %c0_i32_0 = arith.constant 0 : i32
    %c0_i32_1 = arith.constant 0 : i32
    return %c0_i32, %c0_i32_0 : i32, i32
  }
  func.func @transform_6(%arg0: i32) -> (i32, i32) {
    %c0_i32 = arith.constant 0 : i32
    %c0_i32_0 = arith.constant 0 : i32
    %c0_i32_1 = arith.constant 0 : i32
    return %c0_i32, %c0_i32_0 : i32, i32
  }
  func.func @transform_7(%arg0: i32) -> (i32, i32) {
    %c0_i32 = arith.constant 0 : i32
    %c0_i32_0 = arith.constant 0 : i32
    return %arg0, %c0_i32 : i32, i32
  }
}

</mosaic_0001>

<bundles_post_ra>
// kernel: mlp_forward.1
= control target key start
LH: loop header
LB: loop body
LE: loop exit
PB: predicated region body
PF: predicated region fallthrough
CT: control target
= control target key end

     0   :  { %12 = vsyncpa [#allocation3], 0  ;;  %s398_s0 = inlined_call_operand.hbm [shape: f32[8,16], index: 0, kind: input, shape index: {}]   ;;  %s399_s1 = inlined_call_operand.hbm [shape: bf16[16,64], index: 1, kind: input, shape index: {}]   ;;  %s400_s2 = inlined_call_operand.vmem [shape: f32[1,64], index: 2, kind: input, shape index: {}]   ;;  %s401_s3 = inlined_call_operand.vmem [shape: bf16[64,64], index: 3, kind: input, shape index: {}]   ;;  %s402_s4 = inlined_call_operand.vmem [shape: f32[1,64], index: 4, kind: input, shape index: {}]   ;;  %s403_s5 = inlined_call_operand.vmem [shape: bf16[64,4], index: 5, kind: input, shape index: {}]   ;;  %s404_s6 = inlined_call_operand.vmem [shape: f32[1,4], index: 6, kind: input, shape index: {}]   ;;  %s405_s7 = inlined_call_operand.vmem [shape: f32[8,4], index: 7, kind: output, shape index: {}]  }
   0x1   :  { %s19_s26 = sshll.u32 %s398_s0, 4  ;;  %s20_s26 = int_to_ptr.hbm [resolvable:$true] %s19_s26 }
   0x2   :  { %13 = vsyncpa [#allocation5], 0  ;;  %s312_s27 = smov [#allocation2]   ;;  %s29_s8 = sshll.u32 %s399_s1, 4  ;;  %s30_s8 = int_to_ptr.hbm [resolvable:$true] %s29_s8 }
   0x3   :  { %s21_s28 = sshll.u32 %s312_s27, 4  ;;  %s313_s9 = smov [#allocation4]   ;;  %s22_s28 = int_to_ptr.vmem [resolvable:$true] %s21_s28 }
   0x4   :  { %24 = dma.hbm_to_vmem [thread:$0]  %s20_s26, 128, %s22_s28, [#allocation3]  }
   0x5   :  { %s31_s10 = sshll.u32 %s313_s9, 4  ;;  %s314_s11 = smov 64   ;;  %s32_s10 = int_to_ptr.vmem [resolvable:$true] %s31_s10 }
   0x6   :  { %s315_s12 = smov 4  }
   0x7   :  { %37 = dma.hbm_to_vmem [thread:$0]  %s30_s8, 128, %s32_s10, [#allocation5], %s314_s11, %s314_s11, %s315_s12  }
   0x8   :  { %308 = dma.done.wait [#allocation3], 128  }
   0x9   :  { %309 = vsyncadd [#allocation3], 4294967168 }
   0xa   :  { %310 = dma.done.wait [#allocation5], 128  }
   0xb   :  { %311 = vsyncadd [#allocation5], 4294967168  ;;  %v244_v0 = vld [vmem:[#allocation4] sm:$0xff]  ;;  %v57_v1 = vld [vmem:[#allocation2] sm:$0xff]  ;;  %vm71_vm0 = vcmask 130048   ;;  %vm126_vm1 = vcmask 523264  }
   0xc   :  { %v248_v2 = vld [vmem:[%s401_s3 + $0x18] sm:$0xff]  ;;  %v58_v3 = vpack.c.bf16 %v57_v1, %v57_v1  ;;  %82 = vmatpush.bf16.msra.mxu0 %v244_v0  ;;  %v247_v4 = vld [vmem:[%s401_s3 + $0x10] sm:$0xff]  ;;  %v246_v5 = vld [vmem:[%s401_s3 + $0x8] sm:$0xff]  ;;  %vm197_vm2 = vcmask 31744  }
   0xd   :  { %134 = vmatpush.bf16.msra.mxu1 %v248_v2  ;;  %v245_v6 = vld [vmem:[%s401_s3] sm:$0xff]  ;;  %v252_v7 = vld [vmem:[%s403_s5 + $0x18] sm:$0xff]  ;;  %v251_v8 = vld [vmem:[%s403_s5 + $0x10] sm:$0xff] }
   0xe   :  { %188 = vmatpush.bf16.msra.mxu2 %v252_v7  ;;  %v257_v9 = vld [vmem:[%s400_s2] ss:$0 sm:$0xff]  ;;  %v250_v15 = vld [vmem:[%s403_s5 + $0x8] sm:$0xff] }
   0xf   :  { %209 = vmatmul.msk.bf16.vlgmr.msra.gmra.mxu0 %vm71_vm0, %v58_v3  ;;  %v249_v16 = vld [vmem:[%s403_s5] sm:$0xff] }
  0x10   :  { %v258_v17 = vld [vmem:[%s402_s4] ss:$0 sm:$0xff] }
  0x11   :  { %135 = vmatpush.bf16.msra.mxu1 %v247_v4  ;;  %v259_v23 = vld [vmem:[%s404_s6] ss:$0 sm:$0xff] }
  0x12   :  { %189 = vmatpush.bf16.msra.mxu2 %v251_v8 }
  0x15   :  { %136 = vmatpush.bf16.msra.mxu1 %v246_v5 }
  0x16   :  { %190 = vmatpush.bf16.msra.mxu2 %v250_v15 }
  0x19   :  { %137 = vmatpush.bf16.msra.mxu1 %v245_v6 }
  0x1a   :  { %191 = vmatpush.bf16.msra.mxu2 %v249_v16 }
  0x8c   :  { %v84_v10 = vpop.f32.mrf.mxu0 }
  0x8d   :  { %v85_v11 = vadd.f32 %v257_v9, %v84_v10 }
  0x8f   :  { %v88_v12 = vmax.f32 %v85_v11, 0.0 }
  0x91   :  { %v89_v13 = vpack.c.bf16 %v88_v12, %v88_v12 }
  0x93   :  { %226 = vmatmul.msk.bf16.vlgmr.msra.gmra.mxu1 %vm126_vm1, %v89_v13 }
  0x94   :  { %v86_v14 = vpop.f32.mrf.mxu0 }
 0x110   :  { %v139_v18 = vpop.f32.mrf.mxu1 }
 0x111   :  { %v140_v19 = vadd.f32 %v258_v17, %v139_v18 }
 0x113   :  { %v143_v20 = vmax.f32 %v140_v19, 0.0 }
 0x115   :  { %v144_v21 = vpack.c.bf16 %v143_v20, %v143_v20 }
 0x117   :  { %243 = vmatmul.msk.bf16.vlgmr.msra.gmra.mxu2 %vm126_vm1, %v144_v21 }
 0x118   :  { %v141_v22 = vpop.f32.mrf.mxu1 }
 0x19a   :  { %v193_v24 = vpop.f32.mrf.mxu2 }
 0x19b   :  { %v194_v25 = vadd.f32 %v259_v23, %v193_v24 }
 0x19d   :  { %198 = vst.msk [vmem:[%s405_s7] sm:$0xff] %vm197_vm2, %v194_v25 }
 0x1a2   :  { %v195_v26 = vpop.f32.mrf.mxu2 }
 0x1a3   :  { %203 = vsyncpa [#allocation3], 1 }
 0x1a4   :  { %204 = vsyncpa [#allocation5], 1 }

</bundles_post_ra>
